<compile_context>
chip_gen: v7x
topology: tpu7x:2x2x1
jax: 0.10.0
libtpu: 0.0.40
codegen_flags: <defaults>
</compile_context>

<pallas_src>
import jax
import jax.numpy as jnp
from jax.experimental import pallas as pl
from jax.experimental.pallas import tpu as pltpu

EPSILON = 1e-4

# Tile-picking VMEM footprint budget and explicit scoped-VMEM limit (bytes).
# Budget < limit leaves headroom for the conv weight/bias buffers and misc.
_TILE_VMEM_BUDGET = 32 * 1024 * 1024
_VMEM_LIMIT_BYTES = 48 * 1024 * 1024
_MAX_HW_TILE = 8192  # diminishing returns past this; keeps step count sane


def bifpn_add2_kernel(w_ref, x0_ref, x1_ref, cw_ref, cb_ref, o_ref):
    # w_ref : SMEM (2,)  f32   normalized fusion weights
    # x0_ref: VMEM (C1, HWt)   input dtype (f32 or bf16)
    # x1_ref: VMEM (C1, HWt)
    # cw_ref: VMEM (C2, C1)    1x1 conv weight (pre-cast in the wrapper)
    # cb_ref: VMEM (C2, 1)     conv bias (f32)
    # o_ref : VMEM (C2, HWt)
    w0 = w_ref[0]
    w1 = w_ref[1]

    # Weighted fusion of the two feature maps (f32 math; v5e VPU/EUP lack bf16).
    z = (w0 * x0_ref[...].astype(jnp.float32)
         + w1 * x1_ref[...].astype(jnp.float32))                   # (C1, HWt)

    # SiLU.
    s = z * jax.nn.sigmoid(z)                                      # (C1, HWt)

    # 1x1 conv as a channel matmul on the MXU, f32 accumulate, plus bias.
    # Orientation keeps HW on the output lane axis -> lane-dense stores.
    y = jnp.dot(cw_ref[...], s.astype(cw_ref.dtype),
                preferred_element_type=jnp.float32)                # (C2, HWt)
    y = y + cb_ref[...]                                            # bias bcast

    o_ref[...] = y.astype(o_ref.dtype)


def _pick_hw_tile(hw_pad, batch, c1, c2, in_bytes, out_bytes):
    """Largest 128-multiple HW tile whose per-block VMEM footprint fits budget."""
    # Bytes resident per HW element per grid step:
    #   2 inputs x 2 pipeline buffers x C1*in_bytes
    # + 2 output buffers x C2*out_bytes
    # + ~2 f32 intermediates (z, s) x C1*4
    per_elem = 4 * c1 * in_bytes + 2 * c2 * out_bytes + 2 * c1 * 4
    t = min(_TILE_VMEM_BUDGET // per_elem, hw_pad, _MAX_HW_TILE)
    t = max(128, (t // 128) * 128)
    # v7x has 2 TensorCores; guarantee >= 2 "parallel" grid blocks when the
    # batch alone cannot provide them (B=1 inference, single-tile HW).
    if batch == 1 and hw_pad >= 256 and t >= hw_pad:
        t = max(128, ((hw_pad // 2 + 127) // 128) * 128)
    return t


def bifpn_add2_forward(x0, x1, w, conv_w, conv_b, eps=EPSILON):
    """x0, x1: (B, C1, H, W).  w: (2,).  conv_w: (C2, C1, 1, 1).  conv_b: (C2,)."""
    B, C1, H, W = x0.shape
    C2 = conv_w.shape[0]
    HW = H * W

    # Normalized fusion weights (2-element scalar op; done in the wrapper).
    weight = (w / (jnp.sum(w) + eps)).astype(jnp.float32)          # (2,)

    x0f = x0.reshape(B, C1, HW)
    x1f = x1.reshape(B, C1, HW)

    # Pad HW up to a multiple of 128 so output blocks are lane-dense (unmasked
    # stores) even for small pyramid levels; padded columns are dropped after.
    HW_pad = ((HW + 127) // 128) * 128
    if HW_pad != HW:
        pad = HW_pad - HW
        x0f = jnp.pad(x0f, ((0, 0), (0, 0), (0, pad)))
        x1f = jnp.pad(x1f, ((0, 0), (0, 0), (0, pad)))

    out_dtype = x0.dtype
    in_bytes = jnp.dtype(x0.dtype).itemsize
    out_bytes = jnp.dtype(out_dtype).itemsize
    hw_tile = _pick_hw_tile(HW_pad, B, C1, C2, in_bytes, out_bytes)
    n_hw = pl.cdiv(HW_pad, hw_tile)

    # Hoist the conv-weight cast out of the kernel (no per-grid-step cast):
    # bf16 activations -> bf16 weights for the MXU, else f32.
    compute_dtype = jnp.bfloat16 if x0.dtype == jnp.bfloat16 else jnp.float32
    cw = conv_w.reshape(C2, C1).astype(compute_dtype)
    cb = conv_b.reshape(C2, 1).astype(jnp.float32)

    out_flat = pl.pallas_call(
        bifpn_add2_kernel,
        out_shape=jax.ShapeDtypeStruct((B, C2, HW_pad), out_dtype),
        grid_spec=pltpu.PrefetchScalarGridSpec(
            num_scalar_prefetch=0,
            grid=(B, n_hw),
            in_specs=[
                pl.BlockSpec(memory_space=pltpu.MemorySpace.SMEM),          # weight (2,)
                pl.BlockSpec((None, C1, hw_tile), lambda b, t: (b, 0, t)),  # x0
                pl.BlockSpec((None, C1, hw_tile), lambda b, t: (b, 0, t)),  # x1
                pl.BlockSpec((C2, C1), lambda b, t: (0, 0)),                # conv weight
                pl.BlockSpec((C2, 1), lambda b, t: (0, 0)),                 # conv bias
            ],
            out_specs=pl.BlockSpec((None, C2, hw_tile), lambda b, t: (b, 0, t)),
        ),
        compiler_params=pltpu.CompilerParams(
            dimension_semantics=("parallel", "parallel"),
            vmem_limit_bytes=_VMEM_LIMIT_BYTES),
    )(weight, x0f, x1f, cw, cb)

    if HW_pad != HW:
        out_flat = out_flat[:, :, :HW]
    return out_flat.reshape(B, C2, H, W)


def bifpn_add2_reference(x0, x1, w, conv_w, conv_b, eps=EPSILON):
    """Pure-JAX reference matching the PyTorch forward exactly."""
    weight = w / (jnp.sum(w) + eps)
    z = weight[0] * x0 + weight[1] * x1
    s = z * jax.nn.sigmoid(z)                                      # SiLU
    C2, C1 = conv_w.shape[0], conv_w.shape[1]
    y = jnp.einsum('bchw,oc->bohw', s, conv_w.reshape(C2, C1))
    return y + conv_b[None, :, None, None]


if __name__ == "__main__":
    # BiFPN_Add2(c1=64, c2=64); two fused feature maps of (2, 64, 16, 16).
    B, C1, C2, H, W = 2, 64, 64, 16, 16

    key = jax.random.PRNGKey(0)
    k0, k1, kw, kcw, kcb = jax.random.split(key, 5)

    x0 = jax.random.normal(k0, (B, C1, H, W), dtype=jnp.float32)
    x1 = jax.random.normal(k1, (B, C1, H, W), dtype=jnp.float32)
    # Learnable fusion weights (init is ones in PyTorch; perturb to exercise normalization).
    w = jnp.abs(jax.random.normal(kw, (2,), dtype=jnp.float32)) + 0.5
    # 1x1 conv parameters (PyTorch layout: (out, in, 1, 1)).
    conv_w = jax.random.normal(kcw, (C2, C1, 1, 1), dtype=jnp.float32) * 0.05
    conv_b = jax.random.normal(kcb, (C2,), dtype=jnp.float32) * 0.05

    out = bifpn_add2_forward(x0, x1, w, conv_w, conv_b)
    out = jax.block_until_ready(out)

    ref = bifpn_add2_reference(x0, x1, w, conv_w, conv_b)
    assert out.shape == (B, C2, H, W)
    assert jnp.allclose(out, ref, atol=1e-4, rtol=1e-4), "mismatch vs reference"

    print("KERNEL_OK")
</pallas_src>

<mosaic_0001>
module attributes {stable_mosaic.version = 11 : i64} {
  func.func @bifpn_add2_kernel(%arg0: i32, %arg1: i32, %arg2: memref<2xf32, #tpu.memory_space<smem>>, %arg3: memref<1x64x256xf32, #tpu.memory_space<vmem>>, %arg4: memref<1x64x256xf32, #tpu.memory_space<vmem>>, %arg5: memref<64x64xf32, #tpu.memory_space<vmem>>, %arg6: memref<64x1xf32, #tpu.memory_space<vmem>>, %arg7: memref<1x64x256xf32, #tpu.memory_space<vmem>>) attributes {dimension_semantics = [#tpu.dimension_semantics<parallel>, #tpu.dimension_semantics<parallel>], iteration_bounds = array<i64: 2, 1>, scalar_prefetch = 0 : i64, scratch_operands = 0 : i64, tpu.core_type = #tpu.core_type<tc>, window_params = [{transform_indices = @transform_0, window_bounds = array<i64: 2>}, {transform_indices = @transform_1, window_bounds = array<i64: 1, 64, 256>}, {transform_indices = @transform_2, window_bounds = array<i64: 1, 64, 256>}, {pipeline_mode = #tpu.pipeline_mode<synchronous>, transform_indices = @transform_3, window_bounds = array<i64: 64, 64>}, {pipeline_mode = #tpu.pipeline_mode<synchronous>, transform_indices = @transform_4, window_bounds = array<i64: 64, 1>}, {transform_indices = @transform_5, window_bounds = array<i64: 1, 64, 256>}]} {
    %c0 = arith.constant 0 : index
    %0 = memref.load %arg2[%c0] : memref<2xf32, #tpu.memory_space<smem>>
    %c1 = arith.constant 1 : index
    %1 = memref.load %arg2[%c1] : memref<2xf32, #tpu.memory_space<smem>>
    %c0_0 = arith.constant 0 : index
    %c0_1 = arith.constant 0 : index
    %c0_2 = arith.constant 0 : index
    %2 = vector.load %arg3[%c0_0, %c0_1, %c0_2] : memref<1x64x256xf32, #tpu.memory_space<vmem>>, vector<1x64x256xf32>
    %3 = vector.shape_cast %2 : vector<1x64x256xf32> to vector<64x256xf32>
    %4 = vector.broadcast %0 : f32 to vector<64x256xf32>
    %5 = arith.mulf %4, %3 : vector<64x256xf32>
    %c0_3 = arith.constant 0 : index
    %c0_4 = arith.constant 0 : index
    %c0_5 = arith.constant 0 : index
    %6 = vector.load %arg4[%c0_3, %c0_4, %c0_5] : memref<1x64x256xf32, #tpu.memory_space<vmem>>, vector<1x64x256xf32>
    %7 = vector.shape_cast %6 : vector<1x64x256xf32> to vector<64x256xf32>
    %8 = vector.broadcast %1 : f32 to vector<64x256xf32>
    %9 = arith.mulf %8, %7 : vector<64x256xf32>
    %10 = arith.addf %5, %9 : vector<64x256xf32>
    %11 = arith.negf %10 : vector<64x256xf32>
    %12 = math.exp %11 : vector<64x256xf32>
    %cst = arith.constant 1.000000e+00 : f32
    %13 = vector.broadcast %cst : f32 to vector<64x256xf32>
    %14 = arith.addf %13, %12 : vector<64x256xf32>
    %15 = arith.divf %13, %14 : vector<64x256xf32>
    %16 = arith.mulf %10, %15 : vector<64x256xf32>
    %c0_6 = arith.constant 0 : index
    %c0_7 = arith.constant 0 : index
    %17 = vector.load %arg5[%c0_6, %c0_7] : memref<64x64xf32, #tpu.memory_space<vmem>>, vector<64x64xf32>
    %cst_8 = arith.constant dense<0.000000e+00> : vector<64x256xf32>
    %18 = tpu.matmul %17, %16, %cst_8 {dimension_numbers = #tpu.dot_dimension_numbers<[1], [0], [0], [1], [0, 0, 1, 1], [], []>} : vector<64x64xf32>, vector<64x256xf32>, vector<64x256xf32> -> vector<64x256xf32>
    %c0_9 = arith.constant 0 : index
    %c0_10 = arith.constant 0 : index
    %19 = vector.load %arg6[%c0_9, %c0_10] : memref<64x1xf32, #tpu.memory_space<vmem>>, vector<64x1xf32>
    %20 = vector.broadcast %19 : vector<64x1xf32> to vector<64x256xf32>
    %21 = arith.addf %18, %20 : vector<64x256xf32>
    %c0_11 = arith.constant 0 : index
    %c0_12 = arith.constant 0 : index
    %c0_13 = arith.constant 0 : index
    %22 = vector.load %arg7[%c0_11, %c0_12, %c0_13] : memref<1x64x256xf32, #tpu.memory_space<vmem>>, vector<1x64x256xf32>
    %23 = vector.shape_cast %22 : vector<1x64x256xf32> to vector<64x256xf32>
    %24 = vector.shape_cast %21 : vector<64x256xf32> to vector<1x64x256xf32>
    tpu.vector_store %arg7[%c0_11, %c0_12, %c0_13], %24 {strides = array<i32>} : memref<1x64x256xf32, #tpu.memory_space<vmem>>, vector<1x64x256xf32>,
    return
  }
  func.func @transform_0(%arg0: i32, %arg1: i32) -> i32 {
    %c0_i32 = arith.constant 0 : i32
    %c0_i32_0 = arith.constant 0 : i32
    return %c0_i32 : i32
  }
  func.func @transform_1(%arg0: i32, %arg1: i32) -> (i32, i32, i32) {
    %c0_i32 = arith.constant 0 : i32
    %c0_i32_0 = arith.constant 0 : i32
    return %arg0, %c0_i32, %arg1 : i32, i32, i32
  }
  func.func @transform_2(%arg0: i32, %arg1: i32) -> (i32, i32, i32) {
    %c0_i32 = arith.constant 0 : i32
    %c0_i32_0 = arith.constant 0 : i32
    return %arg0, %c0_i32, %arg1 : i32, i32, i32
  }
  func.func @transform_3(%arg0: i32, %arg1: i32) -> (i32, i32) {
    %c0_i32 = arith.constant 0 : i32
    %c0_i32_0 = arith.constant 0 : i32
    %c0_i32_1 = arith.constant 0 : i32
    return %c0_i32, %c0_i32_0 : i32, i32
  }
  func.func @transform_4(%arg0: i32, %arg1: i32) -> (i32, i32) {
    %c0_i32 = arith.constant 0 : i32
    %c0_i32_0 = arith.constant 0 : i32
    %c0_i32_1 = arith.constant 0 : i32
    return %c0_i32, %c0_i32_0 : i32, i32
  }
  func.func @transform_5(%arg0: i32, %arg1: i32) -> (i32, i32, i32) {
    %c0_i32 = arith.constant 0 : i32
    %c0_i32_0 = arith.constant 0 : i32
    return %arg0, %c0_i32, %arg1 : i32, i32, i32
  }
}

</mosaic_0001>

<bundles_post_ra>
// kernel: tpu_custom_call.1
= control target key start
LH: loop header
LB: loop body
LE: loop exit
PB: predicated region body
PF: predicated region fallthrough
CT: control target
= control target key end

     0   :  { %s1790_s0 = inlined_call_operand.vmem [shape: f32[2], index: 0, kind: input, shape index: {}]   ;;  %s1791_s1 = inlined_call_operand.hbm [shape: f32[2,64,256], index: 1, kind: input, shape index: {}]   ;;  %s1792_s2 = inlined_call_operand.hbm [shape: f32[2,64,256], index: 2, kind: input, shape index: {}]   ;;  %s1793_s3 = inlined_call_operand.vmem [shape: f32[64,64], index: 3, kind: input, shape index: {}]   ;;  %s1794_s4 = inlined_call_operand.vmem [shape: f32[64,1], index: 4, kind: input, shape index: {}]   ;;  %s1795_s5 = inlined_call_operand.hbm [shape: f32[2,64,256], index: 5, kind: output, shape index: {}]  }
   0x1   :  { %1803 = sst [smem:[#allocation16_spill]] %s1790_s0 }
   0x2   :  { %1804 = sst [smem:[#allocation17_spill]] %s1791_s1 }
   0x3   :  { %10 = vsyncpa [#allocation5], 0 }
   0x4   :  { %11 = vsyncpa [#allocation3], 0 }
   0x5   :  { %13 = vsyncpa [#allocation3 + $0x1], 0 }
   0x6   :  { %14 = vsyncpa [#allocation8], 0 }
   0x7   :  { %16 = vsyncpa [#allocation8 + $0x1], 0 }
   0x8   :  { %17 = vsyncpa [#allocation4], 0 }
   0x9   :  { %19 = vsyncpa [#allocation4 + $0x1], 0  ;;  %s1299_s18 = smov 0   ;;  %s1301_s19 = smov 0  }
   0xa   :  { %s1303_s20 = smov 0   ;;  %s1305_s21 = smov 0  }
   0xb   :  { %s1307_s22 = smov 0   ;;  %s1309_s23 = smov 0  }
   0xc LB: > { %s869_s24 = sadd.s32 4294967295, %s1257_s23   ;;  %s870_s25 = sadd.s32 4294967294, %s1257_s23   ;;  %s1257_s23 = sphi %s1309_s23, %s25_s23   ;;  %s1253_s22 = sphi %s1307_s22, %s1831_s22   ;;  %s1249_s21 = sphi %s1305_s21, %s1830_s21   ;;  %s1245_s20 = sphi %s1303_s20, %s1829_s20   ;;  %s1241_s19 = sphi %s1301_s19, %s1828_s19   ;;  %s1237_s18 = sphi %s1299_s18, %s1827_s18  }
   0xd   : > { %s67_s26 = sadd.s32 1, %s1245_s20  ;;  %p74_p0 = scmp.ne.s32.totalorder %s1245_s20, %s1241_s19 }
   0xe   : > { %p75_p1 = scmp.eq.s32.totalorder %s1257_s23, 0  ;;  %p80_p2 = scmp.ne.s32.totalorder %s1241_s19, %s1237_s18 }
   0xf   : > { %p1337_p3 = scmp.eq.s32.totalorder %s869_s24, 0  ;;  %p176_p4 = scmp.eq.s32.totalorder %s869_s24, 1 }
  0x10   : > { %p1341_p5 = por %p75_p1, %p74_p0  ;;  %p182_p6 = scmp.eq.s32.totalorder %s870_s25, 1 }
  0x11   : > { %s1805_s27 = scalar_select %p1337_p3, 1, 0 }
  0x12   : > { %p1347_p7 = por %p1337_p3, %p80_p2  ;;  %p1351_p8 = por %p176_p4, %p74_p0 }
  0x13   : > { %p1355_p9 = por %p182_p6, %p80_p2  ;;  %p871_p10 = scmp.ge.s32.totalorder %s1257_s23, 1 }
  0x14   : > { %s1807_s29 = scalar_select %p1347_p7, 1, 0 }
  0x15   : > { %s1808_s30 = scalar_select %p1351_p8, 1, 0 }
  0x16   : > { %s1809_s6 = scalar_select %p1355_p9, 1, 0 }
  0x17   : > { %p189_p11 = scmp.lt.s32.totalorder %s1257_s23, 3  ;;  %s1810_s0 = sld [smem:[#allocation16_spill]] }
  0x18   : > { %p968_p0 = scmp.lt.s32.totalorder %s1257_s23, 2  ;;  %s37_s13 = sadd.s32 1, %s1253_s22 }
  0x19   : > { %p1364_p12 = pnand %p871_p10, %p189_p11  ;;  %p1385_p6 = scmp.ge.s32.totalorder %s37_s13, 2 }
  0x1a   : > { %p1374_p2 = pnand %p968_p0, %p1341_p5  ;;  %s1390_s15 = sand.u32 1, %s1245_s20  }
  0x1b   : > { %p952_p1 = pneg %p1364_p12 }
  0x1d   : > { %s202_s9 = sshll.u32 %s1810_s0, 4  ;;  %p1380_p4 = pnand %p952_p1, %p1337_p3  ;;  %s203_s9 = int_to_ptr.vmem [resolvable:$true] %s202_s9 }
  0x1e   : > { %s1092_s16 = scalar_lea.vmem %s203_s9, 16  ;;  %p1100_p13 = scmp.lt.s32.totalorder %s203_s9, %s203_s9 }
  0x1f   : > { %p1093_p10 = scmp.ne.s32.totalorder %s203_s9, %s1092_s16  ;;  %p1094_p5 = pneg %p1380_p4 }
  0x20   : > { %p1101_p9 = scmp.lt.s32.totalorder %s1092_s16, %s1092_s16 }
  0x21   : > { %p1095_p11 = pnand %p1094_p5, %p1093_p10 }
  0x22   : > { %p1102_p1 = por %p1101_p9, %p1100_p13 }
  0x23   : > { %p1096_p0 = pneg %p1095_p11 }
  0x25   : > { %p1103_p8 = pnand %p1102_p1, %p1096_p0 }
  0x27   : > { %1106 = shalt.err (!%p1103_p8)
}
  0x28   : > { %s1259_s17 = smov [#allocation2]   ;;  %s1833_s13 = smov (%p1385_p6, %s37_s13), 0 }
  0x29   : > { %955 = dma.vmem_to_smem (!%p1380_p4), %s203_s9, 16, %s1259_s17, [#allocation5]  }
  0x2a   : > { %1815 = sst [smem:[#allocation14_spill]] %s1833_s13  ;;  %s1798_s24 = sshll.u32 %s1390_s15, 7 }
  0x2b   : > { %s62_s25 = ssub.s32 %s1253_s22, %s1833_s13  ;;  %s1797_s28 = sshll.u32 %s1253_s22, 11 }
  0x2c   : > { %p65_p8 = scmp.eq.s32.totalorder %s62_s25, 0  ;;  %s1816_s1 = sld [smem:[#allocation17_spill]] }
  0x2d   : > { %s223_s9 = scalar_lea.vmem [#allocation6], %s1798_s24  ;;  %s220_s17 = scalar_lea.sflag [#allocation3], %s1390_s15 }
  0x2e   : > { %s232_s14 = sshll.u32 %s223_s9, 4  ;;  %p1109_p13 = pneg %p1374_p2  ;;  %s1418_s14 = int_to_ptr.vmem [resolvable:$true] %s232_s14 }
  0x2f   : > { %s1416_s16 = scalar_select %p65_p8, %s1245_s20, %s67_s26  }
  0x31   : > { %1817 = sst [smem:[#allocation15_spill]] %s1416_s16 }
  0x32   : > { %s1409_s12 = scalar_lea.hbm %s1816_s1, %s1797_s28  ;;  %s1112_s28 = scalar_lea.hbm %s1816_s1, 4096 }
  0x33   : > { %s1107_s25 = scalar_lea.hbm %s1409_s12, 2048  ;;  %p1113_p10 = scmp.lt.u32.totalorder %s1409_s12, %s1816_s1 }
  0x34   : > { %p1108_p9 = scmp.ne.s32.totalorder %s1409_s12, %s1107_s25  ;;  %p1114_p5 = scmp.lt.u32.totalorder %s1112_s28, %s1107_s25 }
  0x35   : > { %p1116_p0 = scmp.lt.u32.totalorder %s1107_s25, %s1409_s12 }
  0x36   : > { %p1110_p4 = pnand %p1109_p13, %p1108_p9  ;;  %p1115_p11 = por %p1114_p5, %p1113_p10 }
  0x38   : > { %p1111_p6 = pneg %p1110_p4  ;;  %p1117_p1 = por %p1116_p0, %p1115_p11 }
  0x3a   : > { %p1118_p8 = pnand %p1117_p1, %p1111_p6 }
  0x3c   : > { %1121 = shalt.err (!%p1118_p8)
}
  0x3d   : > { %s1122_s26 = scalar_lea.vmem %s1418_s14, 2048  ;;  %s1260_s7 = smov [#allocation6]  }
  0x3e   : > { %p1123_p9 = scmp.ne.s32.totalorder %s1418_s14, %s1122_s26  ;;  %s1127_s8 = sshll.u32 %s1260_s7, 4  ;;  %s1128_s8 = int_to_ptr.vmem [resolvable:$false] %s1127_s8 }
  0x3f   : > { %s1129_s24 = scalar_lea.vmem %s1128_s8, 4096  ;;  %p1130_p3 = scmp.lt.s32.totalorder %s1418_s14, %s1128_s8 }
  0x40   : > { %p1125_p4 = pnand %p1123_p9, %p1109_p13  ;;  %p1131_p10 = scmp.lt.s32.totalorder %s1129_s24, %s1122_s26 }
  0x42   : > { %p1126_p7 = pneg %p1125_p4  ;;  %p1132_p5 = por %p1131_p10, %p1130_p3 }
  0x44   : > { %p1133_p11 = pnand %p1132_p5, %p1126_p7 }
  0x46   : > { %1136 = shalt.err (!%p1133_p11)
}
  0x47   : > { %s1261_s28 = smov 256   ;;  %s1262_s25 = smov 16  }
  0x48   : > { %959 = dma.hbm_to_vmem [thread:$0]  (!%p1374_p2), %s1409_s12, 2048, %s1418_s14, %s220_s17, %s1261_s28, %s1261_s28, %s1262_s25  }
  0x49   : > { %s1818_s9 = sshll.u32 %s1253_s22, 11  ;;  %s1819_s24 = sshll.u32 %s1390_s15, 7 }
  0x4a   : > { %s1456_s8 = scalar_lea.hbm %s1792_s2, %s1818_s9  ;;  %s246_s0 = scalar_lea.vmem [#allocation7], %s1819_s24 }
  0x4b   : > { %s255_s1 = sshll.u32 %s246_s0, 4  ;;  %s243_s13 = scalar_lea.sflag [#allocation8], %s1390_s15  ;;  %s1460_s1 = int_to_ptr.vmem [resolvable:$true] %s255_s1 }
  0x4c   : > { %s1137_s16 = scalar_lea.hbm %s1456_s8, 2048  ;;  %s1142_s17 = scalar_lea.hbm %s1792_s2, 4096 }
  0x4d   : > { %p1138_p3 = scmp.ne.s32.totalorder %s1456_s8, %s1137_s16  ;;  %p1143_p0 = scmp.lt.u32.totalorder %s1456_s8, %s1792_s2 }
  0x4e   : > { %p1144_p1 = scmp.lt.u32.totalorder %s1142_s17, %s1137_s16  ;;  %p1146_p9 = scmp.lt.u32.totalorder %s1137_s16, %s1456_s8 }
  0x4f   : > { %p1140_p7 = pnand %p1138_p3, %p1109_p13 }
  0x50   : > { %p1145_p8 = por %p1144_p1, %p1143_p0 }
  0x51   : > { %p1141_p6 = pneg %p1140_p7 }
  0x52   : > { %p1147_p4 = por %p1146_p9, %p1145_p8 }
  0x54   : > { %p1148_p10 = pnand %p1147_p4, %p1141_p6 }
  0x56   : > { %1151 = shalt.err (!%p1148_p10)
}
  0x57   : > { %s1152_s0 = scalar_lea.vmem %s1460_s1, 2048  ;;  %s1263_s7 = smov [#allocation7]  }
  0x58   : > { %p1153_p5 = scmp.ne.s32.totalorder %s1460_s1, %s1152_s0  ;;  %s1157_s24 = sshll.u32 %s1263_s7, 4  ;;  %s1158_s24 = int_to_ptr.vmem [resolvable:$false] %s1157_s24 }
  0x59   : > { %s1159_s12 = scalar_lea.vmem %s1158_s24, 4096  ;;  %p1160_p7 = scmp.lt.s32.totalorder %s1460_s1, %s1158_s24 }
  0x5a   : > { %p1155_p11 = pnand %p1153_p5, %p1109_p13  ;;  %p1161_p0 = scmp.lt.s32.totalorder %s1159_s12, %s1152_s0 }
  0x5c   : > { %p1156_p3 = pneg %p1155_p11  ;;  %p1162_p1 = por %p1161_p0, %p1160_p7 }
  0x5e   : > { %p1163_p8 = pnand %p1162_p1, %p1156_p3 }
  0x60   : > { %1166 = shalt.err (!%p1163_p8)
}
  0x61   : > { %962 = dma.hbm_to_vmem [thread:$0]  (!%p1374_p2), %s1456_s8, 2048, %s1460_s1, %s243_s13, %s1261_s28, %s1261_s28, %s1262_s25  }
  0x62   : > { %267 = sbr.rel (%p1364_p12) target bundleno = 428 (0x1ac), region = 40  ;;  %p1820_p13 = scmp.ne.s32.totalorder (!%p1364_p12), %s1805_s27, 0 }
  0x69   : > { %1220 = dma.done.wait (%p1820_p13), [#allocation5], 16  }
  0x6a   : > { %1222 = vsyncadd (%p1820_p13), [#allocation5], 4294967280  ;;  %s1498_s11 = sand.u32 1, %s1241_s19   ;;  %p1821_p2 = scmp.ne.s32.totalorder %s1807_s29, 0 }
  0x6b   : > { %s1501_s16 = sshll.u32 %s1498_s11, 7  ;;  %s274_s15 = scalar_lea.sflag [#allocation3], %s1498_s11 }
  0x6c   : > { %s1505_s1 = scalar_lea.vmem [#allocation6], %s1501_s16 }
  0x6d   : > { %1224 = dma.done.wait (%p1821_p2), %s274_s15, 2048  }
  0x6e   : > { %1226 = vsyncadd (%p1821_p2), %s274_s15, 4294965248  ;;  %s283_s27 = scalar_lea.sflag [#allocation8], %s1498_s11  ;;  %s1513_s10 = scalar_lea.vmem [#allocation7], %s1501_s16 }
  0x6f   : > { %1228 = dma.done.wait (%p1821_p2), %s283_s27, 2048  }
  0x70   : > { %1230 = vsyncadd (%p1821_p2), %s283_s27, 4294965248 }
  0x71   : > { %291 = sfence }
  0x72   : > { %s322_s13 = sld [smem:[#allocation2]]  ;;  %s885_s28 = sld [smem:[#allocation2 + $0x1]]  ;;  %v1264_v0 = vmov 0.0   ;;  %v325_v1 = vld [vmem:[%s1505_s1 + $0x8] sm:$0xff]  ;;  %v327_v2 = vld [vmem:[%s1505_s1 + $0x18] sm:$0xff]  ;;  %v1265_v3 = vmov 0  }
  0x73   : > { %663 = vmatprep.mubr.f32.mxu0 %v1264_v0  ;;  %687 = vmatprep.mubr.f32.mxu1 %v1264_v0  ;;  %v358_v4 = vld [vmem:[%s1513_s10 + $0x8] sm:$0xff]  ;;  %v360_v5 = vld [vmem:[%s1513_s10 + $0x18] sm:$0xff]  ;;  %v324_v6 = vld [vmem:[%s1505_s1] sm:$0xff]  ;;  %vm574_vm0 = vcmask 523264   ;;  %s1716_s29 = scalar_lea.vmem [#allocation9], %s1501_s16  ;;  %s917_s16 = sshll.u32 %s1249_s21, 11 }
  0x74   : > { %1027 = vset.pattern.permute.xlu1 %v1265_v3  ;;  %1026 = vset.pattern.permute.xlu0 %v1265_v3  ;;  %v326_v7 = vld [vmem:[%s1505_s1 + $0x10] sm:$0xff]  ;;  %v357_v8 = vld [vmem:[%s1513_s10] sm:$0xff]  ;;  %v329_v12 = vld [vmem:[%s1505_s1 + $0x28] sm:$0xff]  ;;  %s1735_s25 = scalar_lea.hbm %s1795_s5, %s917_s16  ;;  %s729_s8 = scalar_lea.sflag [#allocation4], %s1498_s11 }
  0x75   : > { %v359_v9 = vld [vmem:[%s1513_s10 + $0x10] sm:$0xff]  ;;  %v331_v13 = vld [vmem:[%s1505_s1 + $0x38] sm:$0xff]  ;;  %v362_v18 = vld [vmem:[%s1513_s10 + $0x28] sm:$0xff]  ;;  %p1822_p6 = scmp.ne.s32.totalorder %s1808_s30, 0  ;;  %s1266_s17 = smov [#allocation9]  }
  0x76   : > { %v364_v19 = vld [vmem:[%s1513_s10 + $0x38] sm:$0xff]  ;;  %v328_v24 = vld [vmem:[%s1505_s1 + $0x20] sm:$0xff]  ;;  %v330_v25 = vld [vmem:[%s1505_s1 + $0x30] sm:$0xff]  ;;  %s1171_s9 = sshll.u32 %s1266_s17, 4  ;;  %s1172_s9 = int_to_ptr.vmem [resolvable:$false] %s1171_s9 }
  0x77   : > { %v361_v34 = vld [vmem:[%s1513_s10 + $0x20] sm:$0xff]  ;;  %v363_v35 = vld [vmem:[%s1513_s10 + $0x30] sm:$0xff]  ;;  %v333_v36 = vld [vmem:[%s1505_s1 + $0x48] sm:$0xff]  ;;  %s1173_s26 = scalar_lea.vmem %s1172_s9, 4096 }
  0x78   : > { %v1529_v10 = vstv %s322_s13  ;;  %v1531_v11 = vstv %s885_s28  ;;  %v335_v41 = vld [vmem:[%s1505_s1 + $0x58] sm:$0xff]  ;;  %v366_v46 = vld [vmem:[%s1513_s10 + $0x48] sm:$0xff] }
  0x79   : > { %v342_v14 = vmul.f32 %v1529_v10, %v325_v1  ;;  %v344_v15 = vmul.f32 %v1529_v10, %v327_v2  ;;  %v375_v16 = vmul.f32 %v1531_v11, %v358_v4  ;;  %v377_v17 = vmul.f32 %v1531_v11, %v360_v5  ;;  %v368_v50 = vld [vmem:[%s1513_s10 + $0x58] sm:$0xff]  ;;  %v332_v51 = vld [vmem:[%s1505_s1 + $0x40] sm:$0xff]  ;;  %v334_v52 = vld [vmem:[%s1505_s1 + $0x50] sm:$0xff] }
  0x7a   : > { %v341_v20 = vmul.f32 %v1529_v10, %v324_v6  ;;  %v343_v21 = vmul.f32 %v1529_v10, %v326_v7  ;;  %v374_v22 = vmul.f32 %v1531_v11, %v357_v8  ;;  %v376_v23 = vmul.f32 %v1531_v11, %v359_v9  ;;  %v365_v56 = vld [vmem:[%s1513_s10 + $0x40] sm:$0xff]  ;;  %v367_v60 = vld [vmem:[%s1513_s10 + $0x50] sm:$0xff]  ;;  %v529_v6 = vld [vmem:[%s1794_s4 + $0x18] sm:$0xff] }
  0x7b   : > { %v1547_v26 = vadd.f32 %v375_v16, %v342_v14  ;;  %v1549_v27 = vadd.f32 %v377_v17, %v344_v15  ;;  %v346_v28 = vmul.f32 %v1529_v10, %v329_v12  ;;  %v348_v29 = vmul.f32 %v1529_v10, %v331_v13  ;;  %v528_v61 = vld [vmem:[%s1794_s4 + $0x10] sm:$0xff]  ;;  %v526_v62 = vld [vmem:[%s1794_s4] sm:$0xff]  ;;  %v527_v7 = vld [vmem:[%s1794_s4 + $0x8] sm:$0xff] }
  0x7c   : > { %v1553_v30 = vadd.f32 %v374_v22, %v341_v20  ;;  %v1555_v31 = vadd.f32 %v376_v23, %v343_v21  ;;  %v379_v32 = vmul.f32 %v1531_v11, %v362_v18  ;;  %v381_v33 = vmul.f32 %v1531_v11, %v364_v19  ;;  %546 = vperm.xlu1 %1027, %v528_v61   ;;  %v337_v17 = vld [vmem:[%s1505_s1 + $0x68] sm:$0xff]  ;;  %v530_v20 = vld [vmem:[%s1794_s4 + $0x20] sm:$0xff] }
  0x7d   : > { %v887_v37 = vmul.f32 -1.442695, %v1547_v26  ;;  %v889_v38 = vmul.f32 -1.442695, %v1549_v27  ;;  %v345_v39 = vmul.f32 %v1529_v10, %v328_v24  ;;  %v347_v40 = vmul.f32 %v1529_v10, %v330_v25  ;;  %536 = vperm.xlu0 %1026, %v526_v62   ;;  %v370_v18 = vld [vmem:[%s1513_s10 + $0x68] sm:$0xff]  ;;  %v339_v24 = vld [vmem:[%s1505_s1 + $0x78] sm:$0xff] }
  0x7e   : > { %v886_v42 = vmul.f32 -1.442695, %v1553_v30  ;;  %v888_v43 = vmul.f32 -1.442695, %v1555_v31  ;;  %v1569_v44 = vadd.f32 %v379_v32, %v346_v28  ;;  %v1571_v45 = vadd.f32 %v381_v33, %v348_v29  ;;  %v531_v19 = vld [vmem:[%s1794_s4 + $0x28] sm:$0xff]  ;;  %v372_v32 = vld [vmem:[%s1513_s10 + $0x78] sm:$0xff] }
  0x7f   : > { %1028 = vpow2.f32 %v887_v37  ;;  %v378_v47 = vmul.f32 %v1531_v11, %v361_v34  ;;  %v380_v48 = vmul.f32 %v1531_v11, %v363_v35  ;;  %v350_v49 = vmul.f32 %v1529_v10, %v333_v36  ;;  %v336_v34 = vld [vmem:[%s1505_s1 + $0x60] sm:$0xff] }
  0x80   : > { %1030 = vpow2.f32 %v889_v38  ;;  %v891_v53 = vmul.f32 -1.442695, %v1569_v44  ;;  %v893_v54 = vmul.f32 -1.442695, %v1571_v45  ;;  %v352_v55 = vmul.f32 %v1529_v10, %v335_v41  ;;  %551 = vperm.xlu1 %1027, %v529_v6   ;;  %v369_v37 = vld [vmem:[%s1513_s10 + $0x60] sm:$0xff]  ;;  %v533_v38 = vld [vmem:[%s1794_s4 + $0x38] sm:$0xff] }
  0x81   : > { %1032 = vpow2.f32 %v886_v42  ;;  %v1584_v57 = vadd.f32 %v378_v47, %v345_v39  ;;  %v1586_v58 = vadd.f32 %v380_v48, %v347_v40  ;;  %v383_v59 = vmul.f32 %v1531_v11, %v366_v46  ;;  %541 = vperm.xlu0 %1026, %v527_v7   ;;  %v532_v39 = vld [vmem:[%s1794_s4 + $0x30] sm:$0xff] }
  0x82   : > { %1034 = vpow2.f32 %v888_v43  ;;  %v385_v63 = vmul.f32 %v1531_v11, %v368_v50  ;;  %v349_v1 = vmul.f32 %v1529_v10, %v332_v51  ;;  %v351_v2 = vmul.f32 %v1529_v10, %v334_v52  ;;  %v338_v43 = vld [vmem:[%s1505_s1 + $0x70] sm:$0xff]  ;;  %s744_s1 = sshll.u32 %s1716_s29, 4  ;;  %s1737_s1 = int_to_ptr.vmem [resolvable:$true] %s744_s1 }
  0x83   : > { %1036 = vpow2.f32 %v891_v53  ;;  %v890_v3 = vmul.f32 -1.442695, %v1584_v57  ;;  %v892_v4 = vmul.f32 -1.442695, %v1586_v58  ;;  %v1601_v5 = vadd.f32 %v383_v59, %v350_v49  ;;  %v371_v46 = vld [vmem:[%s1513_s10 + $0x70] sm:$0xff]  ;;  %s1167_s14 = scalar_lea.vmem %s1737_s1, 2048  ;;  %p1174_p10 = scmp.lt.s32.totalorder %s1737_s1, %s1172_s9 }
  0x84   : > { %1038 = vpow2.f32 %v893_v54  ;;  %v1609_v8 = vadd.f32 %v385_v63, %v352_v55  ;;  %v382_v9 = vmul.f32 %v1531_v11, %v365_v56  ;;  %v384_v12 = vmul.f32 %v1531_v11, %v367_v60  ;;  %561 = vperm.xlu1 %1027, %v531_v19   ;;  %p1168_p12 = scmp.ne.s32.totalorder %s1737_s1, %s1167_s14  ;;  %p1175_p5 = scmp.lt.s32.totalorder %s1173_s26, %s1167_s14 }
  0x85   : > { %1040 = vpow2.f32 %v890_v3  ;;  %v895_v13 = vmul.f32 -1.442695, %v1601_v5  ;;  %v354_v29 = vmul.f32 %v1529_v10, %v337_v17  ;;  %v387_v33 = vmul.f32 %v1531_v11, %v370_v18  ;;  %556 = vperm.xlu0 %1026, %v530_v20  }
  0x86   : > { %1042 = vpow2.f32 %v892_v4  ;;  %v897_v14 = vmul.f32 -1.442695, %v1609_v8  ;;  %v1615_v15 = vadd.f32 %v382_v9, %v349_v1  ;;  %v1617_v16 = vadd.f32 %v384_v12, %v351_v2  ;;  %p1169_p9 = pnand %p1168_p12, %p1822_p6  ;;  %p1176_p11 = por %p1175_p5, %p1174_p10 }
  0x87   : > { %1044 = vpow2.f32 %v895_v13  ;;  %v356_v42 = vmul.f32 %v1529_v10, %v339_v24  ;;  %v389_v49 = vmul.f32 %v1531_v11, %v372_v32  ;;  %v353_v50 = vmul.f32 %v1529_v10, %v336_v34 }
  0x88   : > { %1046 = vpow2.f32 %v897_v14  ;;  %v894_v21 = vmul.f32 -1.442695, %v1615_v15  ;;  %v896_v22 = vmul.f32 -1.442695, %v1617_v16  ;;  %v1646_v53 = vadd.f32 %v387_v33, %v354_v29  ;;  %571 = vperm.xlu1 %1027, %v533_v38   ;;  %p1170_p4 = pneg %p1169_p9 }
  0x89   : > { %v1029_v23 = vpop.eup %1028  ;;  %v386_v54 = vmul.f32 %v1531_v11, %v369_v37  ;;  %566 = vperm.xlu0 %1026, %v532_v39   ;;  %v355_v59 = vmul.f32 %v1529_v10, %v338_v43  ;;  %v388_v60 = vmul.f32 %v1531_v11, %v371_v46  ;;  %v1651_v2 = vadd.f32 %v389_v49, %v356_v42 }
  0x8a   : > { %v1031_v25 = vpop.eup %1030  ;;  %v455_v28 = vadd.f32 1.0, %v1029_v23  ;;  %1048 = vpow2.f32 %v894_v21  ;;  %v899_v6 = vmul.f32 -1.442695, %v1646_v53  ;;  %p1177_p3 = pnand %p1176_p11, %p1170_p4 }
  0x8b   : > { %v1033_v35 = vpop.eup %1032  ;;  %v457_v36 = vadd.f32 1.0, %v1031_v25  ;;  %1050 = vpow2.f32 %v896_v22  ;;  %v1654_v7 = vadd.f32 %v386_v54, %v353_v50  ;;  %v1656_v10 = vadd.f32 %v388_v60, %v355_v59 }
  0x8c   : > { %v1035_v40 = vpop.eup %1034  ;;  %1052 = vrcp.f32 %v455_v28  ;;  %v454_v41 = vadd.f32 1.0, %v1033_v35  ;;  %v901_v14 = vmul.f32 -1.442695, %v1651_v2 }
  0x8d   : > { %v1037_v47 = vpop.eup %1036  ;;  %1054 = vrcp.f32 %v457_v36  ;;  %v456_v48 = vadd.f32 1.0, %v1035_v40  ;;  %v898_v19 = vmul.f32 -1.442695, %v1654_v7  ;;  %v900_v22 = vmul.f32 -1.442695, %v1656_v10 }
  0x8e   : > { %v1039_v51 = vpop.eup %1038  ;;  %1056 = vrcp.f32 %v454_v41  ;;  %v459_v52 = vadd.f32 1.0, %v1037_v47 }
  0x8f   : > { %v1041_v55 = vpop.eup %1040  ;;  %1058 = vrcp.f32 %v456_v48  ;;  %v461_v56 = vadd.f32 1.0, %v1039_v51 }
  0x90   : > { %v1043_v61 = vpop.eup %1042  ;;  %1060 = vrcp.f32 %v459_v52  ;;  %v458_v62 = vadd.f32 1.0, %v1041_v55 }
  0x91   : > { %v1045_v63 = vpop.eup %1044  ;;  %1062 = vrcp.f32 %v461_v56  ;;  %v460_v1 = vadd.f32 1.0, %v1043_v61 }
  0x92   : > { %v1047_v3 = vpop.eup %1046  ;;  %1064 = vrcp.f32 %v458_v62  ;;  %v463_v4 = vadd.f32 1.0, %v1045_v63 }
  0x93   : > { %1066 = vrcp.f32 %v460_v1  ;;  %v465_v9 = vadd.f32 1.0, %v1047_v3  ;;  %v518_v3 = vld [vmem:[%s1793_s3] sm:$0xff] }
  0x94   : > { %v1049_v11 = vpop.eup %1048  ;;  %1068 = vrcp.f32 %v463_v4  ;;  %v523_v4 = vld [vmem:[%s1793_s3 + $0x28] sm:$0xff] }
  0x95   : > { %v1051_v12 = vpop.eup %1050  ;;  %1070 = vrcp.f32 %v465_v9  ;;  %v462_v13 = vadd.f32 1.0, %v1049_v11  ;;  %v521_v9 = vld [vmem:[%s1793_s3 + $0x18] sm:$0xff] }
  0x96   : > { %v1053_v17 = vpop.eup %1052  ;;  %v464_v18 = vadd.f32 1.0, %v1051_v12  ;;  %1072 = vpow2.f32 %v899_v6  ;;  %v520_v6 = vld [vmem:[%s1793_s3 + $0x10] sm:$0xff] }
  0x97   : > { %v1055_v20 = vpop.eup %1054  ;;  %v503_v21 = vmul.f32 %v1053_v17, %v1547_v26  ;;  %1074 = vrcp.f32 %v462_v13 }
  0x98   : > { %v1057_v23 = vpop.eup %1056  ;;  %v505_v24 = vmul.f32 %v1055_v20, %v1549_v27  ;;  %1076 = vrcp.f32 %v464_v18 }
  0x99   : > { %v1059_v25 = vpop.eup %1058  ;;  %v502_v28 = vmul.f32 %v1057_v23, %v1553_v30  ;;  %1078 = vpow2.f32 %v901_v14 }
  0x9a   : > { %v1061_v29 = vpop.eup %1060  ;;  %v918_v32 = vpack.c.bf16 %v505_v24, %v503_v21  ;;  %v504_v33 = vmul.f32 %v1059_v25, %v1555_v31  ;;  %1080 = vpow2.f32 %v898_v19 }
  0x9b   : > { %v1063_v34 = vpop.eup %1062  ;;  %v507_v35 = vmul.f32 %v1061_v29, %v1569_v44  ;;  %1082 = vpow2.f32 %v900_v22 }
  0x9c   : > { %v1065_v26 = vpop.eup %1064  ;;  %919 = vmatprep.subr.bf16.mxu0 %v918_v32  ;;  %934 = vmatprep.subr.bf16.mxu1 %v918_v32  ;;  %v920_v36 = vpack.c.bf16 %v504_v33, %v502_v28  ;;  %v509_v27 = vmul.f32 %v1063_v34, %v1571_v45 }
  0x9d   : > { %v1067_v37 = vpop.eup %1066  ;;  %v506_v38 = vmul.f32 %v1065_v26, %v1584_v57 }
  0x9e   : > { %v1069_v30 = vpop.eup %1068  ;;  %921 = vmatpush1.bf16.msra.mxu0 %v920_v36  ;;  %938 = vmatpush1.bf16.msra.mxu1 %v920_v36  ;;  %v922_v39 = vpack.c.bf16 %v509_v27, %v507_v35  ;;  %v508_v31 = vmul.f32 %v1067_v37, %v1586_v58 }
  0x9f   : > { %v1071_v40 = vpop.eup %1070  ;;  %v511_v41 = vmul.f32 %v1069_v30, %v1601_v5 }
  0xa0   : > { %v1073_v44 = vpop.eup %1072  ;;  %923 = vmatprep.subr.bf16.mxu0 %v922_v39  ;;  %935 = vmatprep.subr.bf16.mxu1 %v922_v39  ;;  %v924_v42 = vpack.c.bf16 %v508_v31, %v506_v38  ;;  %v513_v43 = vmul.f32 %v1071_v40, %v1609_v8 }
  0xa1   : > { %v1075_v46 = vpop.eup %1074  ;;  %v467_v45 = vadd.f32 1.0, %v1073_v44 }
  0xa2   : > { %v1077_v47 = vpop.eup %1076  ;;  %925 = vmatpush1.bf16.msra.mxu0 %v924_v42  ;;  %939 = vmatpush1.bf16.msra.mxu1 %v924_v42  ;;  %v926_v57 = vpack.c.bf16 %v513_v43, %v511_v41  ;;  %v510_v48 = vmul.f32 %v1075_v46, %v1615_v15 }
  0xa3   : > { %v1079_v49 = vpop.eup %1078  ;;  %v512_v58 = vmul.f32 %v1077_v47, %v1617_v16  ;;  %1084 = vrcp.f32 %v467_v45 }
  0xa4   : > { %v1081_v50 = vpop.eup %1080  ;;  %927 = vmatprep.subr.bf16.mxu0 %v926_v57  ;;  %936 = vmatprep.subr.bf16.mxu1 %v926_v57  ;;  %v469_v5 = vadd.f32 1.0, %v1079_v49 }
  0xa5   : > { %v1083_v51 = vpop.eup %1082  ;;  %v928_v52 = vpack.c.bf16 %v512_v58, %v510_v48  ;;  %v466_v54 = vadd.f32 1.0, %v1081_v50 }
  0xa6   : > { %1086 = vrcp.f32 %v469_v5  ;;  %v468_v8 = vadd.f32 1.0, %v1083_v51 }
  0xa7   : > { %929 = vmatpush1.bf16.msra.mxu0 %v928_v52  ;;  %940 = vmatpush1.bf16.msra.mxu1 %v928_v52  ;;  %1088 = vrcp.f32 %v466_v54 }
  0xa8   : > { %1090 = vrcp.f32 %v468_v8 }
  0xad   : > { %v1085_v55 = vpop.eup %1084 }
  0xae   : > { %v515_v15 = vmul.f32 %v1085_v55, %v1646_v53  ;;  %v522_v53 = vld [vmem:[%s1793_s3 + $0x20] sm:$0xff] }
  0xb0   : > { %v1087_v56 = vpop.eup %1086 }
  0xb1   : > { %v1089_v59 = vpop.eup %1088  ;;  %v517_v16 = vmul.f32 %v1087_v56, %v1651_v2  ;;  %v519_v2 = vld [vmem:[%s1793_s3 + $0x8] sm:$0xff] }
  0xb2   : > { %v1091_v60 = vpop.eup %1090  ;;  %v514_v61 = vmul.f32 %v1089_v59, %v1654_v7  ;;  %v524_v7 = vld [vmem:[%s1793_s3 + $0x30] sm:$0xff] }
  0xb3   : > { %v930_v62 = vpack.c.bf16 %v517_v16, %v515_v15  ;;  %v516_v63 = vmul.f32 %v1091_v60, %v1656_v10  ;;  %v525_v10 = vld [vmem:[%s1793_s3 + $0x38] sm:$0xff] }
  0xb5   : > { %931 = vmatprep.subr.bf16.mxu0 %v930_v62  ;;  %937 = vmatprep.subr.bf16.mxu1 %v930_v62  ;;  %v932_v1 = vpack.c.bf16 %v516_v63, %v514_v61 }
  0xb7   : > { %933 = vmatpush1.bf16.msra.mxu0 %v932_v1  ;;  %941 = vmatpush1.bf16.msra.mxu1 %v932_v1 }
  0xba   : > { %902 = vmatmul.mubr.msk.f32.vlgmr.msra.gmra.mrb[0].mxu0 %vm574_vm0, %v518_v3  ;;  %906 = vmatmul.mubr.msk.f32.vlgmr.msra.gmra.mrb[0].mxu1 %vm574_vm0, %v522_v53 }
  0xbb   : > { %669 = vmatprep.mubr.f32.mxu0 %v1264_v0  ;;  %693 = vmatprep.mubr.f32.mxu1 %v1264_v0 }
  0xbe   : > { %903 = vmatmul.mubr.msk.f32.gmra.mrb[2].mxu0 %vm574_vm0, %v519_v2  ;;  %907 = vmatmul.mubr.msk.f32.gmra.mrb[2].mxu1 %vm574_vm0, %v523_v4 }
  0xbf   : > { %675 = vmatprep.mubr.f32.mxu0 %v1264_v0  ;;  %699 = vmatprep.mubr.f32.mxu1 %v1264_v0 }
  0xc2   : > { %904 = vmatmul.mubr.msk.f32.gmra.mrb[4].mxu0 %vm574_vm0, %v520_v6  ;;  %908 = vmatmul.mubr.msk.f32.gmra.mrb[4].mxu1 %vm574_vm0, %v524_v7 }
  0xc3   : > { %681 = vmatprep.mubr.f32.mxu0 %v1264_v0  ;;  %705 = vmatprep.mubr.f32.mxu1 %v1264_v0 }
  0xc6   : > { %905 = vmatmul.mubr.msk.f32.gmra.mrb[6].mxu0 %vm574_vm0, %v521_v9  ;;  %909 = vmatmul.mubr.msk.f32.gmra.mrb[6].mxu1 %vm574_vm0, %v525_v10 }
  0xfb   : > { %v547_v12 = vpop.permute.xlu1 %546 }
  0xfc   : > { %v537_v11 = vpop.permute.xlu0 %536 }
  0xff   : > { %v552_v14 = vpop.permute.xlu1 %551 }
 0x100   : > { %v542_v13 = vpop.permute.xlu0 %541 }
 0x103   : > { %v562_v25 = vpop.permute.xlu1 %561 }
 0x104   : > { %v557_v17 = vpop.permute.xlu0 %556 }
 0x107   : > { %v572_v42 = vpop.permute.xlu1 %571 }
 0x108   : > { %v567_v27 = vpop.permute.xlu0 %566 }
 0x18d   : > { %v665_v18 = vpop.f32.mrb[0].mxu0  ;;  %v689_v0 = vpop.f32.mrb[0].mxu1 }
 0x18e   : > { %v666_v19 = vadd.f32 %v665_v18, %v537_v11  ;;  %v690_v20 = vadd.f32 %v689_v0, %v557_v17  ;;  %v667_v21 = vpop.f32.mrb[1].mxu0  ;;  %v691_v22 = vpop.f32.mrb[1].mxu1 }
 0x18f   : > { %v668_v23 = vadd.f32 %v667_v21, %v537_v11  ;;  %v692_v24 = vadd.f32 %v691_v22, %v557_v17 }
 0x190   : > { %712 = vst [vmem:[%s1716_s29] sm:$0xff] %v666_v19  ;;  %720 = vst [vmem:[%s1716_s29 + $0x40] sm:$0xff] %v690_v20 }
 0x191   : > { %713 = vst [vmem:[%s1716_s29 + $0x8] sm:$0xff] %v668_v23  ;;  %721 = vst [vmem:[%s1716_s29 + $0x48] sm:$0xff] %v692_v24  ;;  %v671_v28 = vpop.f32.mrb[2].mxu0  ;;  %v695_v29 = vpop.f32.mrb[2].mxu1 }
 0x192   : > { %v672_v32 = vadd.f32 %v671_v28, %v542_v13  ;;  %v696_v33 = vadd.f32 %v695_v29, %v562_v25  ;;  %v673_v34 = vpop.f32.mrb[3].mxu0  ;;  %v697_v35 = vpop.f32.mrb[3].mxu1 }
 0x193   : > { %v674_v26 = vadd.f32 %v673_v34, %v542_v13  ;;  %v698_v36 = vadd.f32 %v697_v35, %v562_v25 }
 0x194   : > { %714 = vst [vmem:[%s1716_s29 + $0x10] sm:$0xff] %v672_v32  ;;  %722 = vst [vmem:[%s1716_s29 + $0x50] sm:$0xff] %v696_v33 }
 0x195   : > { %715 = vst [vmem:[%s1716_s29 + $0x18] sm:$0xff] %v674_v26  ;;  %723 = vst [vmem:[%s1716_s29 + $0x58] sm:$0xff] %v698_v36  ;;  %v677_v37 = vpop.f32.mrb[4].mxu0  ;;  %v701_v38 = vpop.f32.mrb[4].mxu1 }
 0x196   : > { %v678_v30 = vadd.f32 %v677_v37, %v547_v12  ;;  %v702_v39 = vadd.f32 %v701_v38, %v567_v27  ;;  %v679_v31 = vpop.f32.mrb[5].mxu0  ;;  %v703_v40 = vpop.f32.mrb[5].mxu1 }
 0x197   : > { %v680_v41 = vadd.f32 %v679_v31, %v547_v12  ;;  %v704_v44 = vadd.f32 %v703_v40, %v567_v27 }
 0x198   : > { %716 = vst [vmem:[%s1716_s29 + $0x20] sm:$0xff] %v678_v30  ;;  %724 = vst [vmem:[%s1716_s29 + $0x60] sm:$0xff] %v702_v39 }
 0x199   : > { %717 = vst [vmem:[%s1716_s29 + $0x28] sm:$0xff] %v680_v41  ;;  %725 = vst [vmem:[%s1716_s29 + $0x68] sm:$0xff] %v704_v44  ;;  %v683_v43 = vpop.f32.mrb[6].mxu0  ;;  %v707_v46 = vpop.f32.mrb[6].mxu1 }
 0x19a   : > { %v684_v45 = vadd.f32 %v683_v43, %v552_v14  ;;  %v708_v47 = vadd.f32 %v707_v46, %v572_v42  ;;  %v685_v57 = vpop.f32.mrb[7].mxu0  ;;  %v709_v48 = vpop.f32.mrb[7].mxu1 }
 0x19b   : > { %v686_v49 = vadd.f32 %v685_v57, %v552_v14  ;;  %v710_v58 = vadd.f32 %v709_v48, %v572_v42 }
 0x19c   : > { %718 = vst [vmem:[%s1716_s29 + $0x30] sm:$0xff] %v684_v45  ;;  %726 = vst [vmem:[%s1716_s29 + $0x70] sm:$0xff] %v708_v47 }
 0x19d   : > { %719 = vst [vmem:[%s1716_s29 + $0x38] sm:$0xff] %v686_v49  ;;  %727 = vst [vmem:[%s1716_s29 + $0x78] sm:$0xff] %v710_v58 }
 0x19e   : > { %1180 = shalt.err (!%p1177_p3)
}
 0x19f   : > { %s1181_s0 = scalar_lea.hbm %s1735_s25, 2048  ;;  %s1185_s12 = scalar_lea.hbm %s1795_s5, 4096 }
 0x1a0   : > { %p1182_p7 = scmp.ne.s32.totalorder %s1735_s25, %s1181_s0  ;;  %p1186_p8 = scmp.lt.u32.totalorder %s1735_s25, %s1795_s5 }
 0x1a1   : > { %p1187_p13 = scmp.lt.u32.totalorder %s1185_s12, %s1181_s0  ;;  %p1189_p12 = scmp.lt.u32.totalorder %s1181_s0, %s1735_s25 }
 0x1a2   : > { %p1183_p0 = pnand %p1182_p7, %p1822_p6 }
 0x1a3   : > { %p1188_p2 = por %p1187_p13, %p1186_p8 }
 0x1a4   : > { %p1184_p1 = pneg %p1183_p0 }
 0x1a5   : > { %p1190_p9 = por %p1189_p12, %p1188_p2 }
 0x1a7   : > { %p1191_p4 = pnand %p1190_p9, %p1184_p1 }
 0x1a9   : > { %1194 = shalt.err (!%p1191_p4)
}
 0x1aa   : > { %s1267_s13 = smov 256   ;;  %s1268_s28 = smov 16  }
 0x1ab   : > { %950 = dma.vmem_to_hbm [thread:$0]  (%p1822_p6), %s1737_s1, 2048, %s1735_s25, %s729_s8, %s1267_s13, %s1267_s13, %s1268_s28  }
 0x1ac PF: > { %s759_s29 = sand.u32 1, %s1237_s18   ;;  %p1823_p10 = scmp.ne.s32.totalorder %s1809_s6, 0 }
 0x1ad   : > { %p1824_p5 = scmp.ge.s32.totalorder %s1257_s23, 2  ;;  %s760_s16 = scalar_lea.sflag [#allocation4], %s759_s29 }
 0x1af   : > { %p964_p11 = pnand %p1824_p5, %p1823_p10 }
 0x1b1   : > { %1232 = dma.done.wait (!%p964_p11), %s760_s16, 2048  }
 0x1b2   : > { %1234 = vsyncadd (!%p964_p11), %s760_s16, 4294965248  ;;  %s25_s23 = sadd.s32 1, %s1257_s23   ;;  %s1825_s10 = sld [smem:[#allocation15_spill]] }
 0x1b3   : > { %p22_p3 = scmp.ge.s32.totalorder %s25_s23, 4   ;;  %s1826_s30 = sld [smem:[#allocation14_spill]] }
 0x1b4   : > { %s1827_s18 = smov %s1241_s19  ;;  %s1828_s19 = smov %s1245_s20 }
 0x1b5   : > { %s1830_s21 = smov %s1253_s22  ;;  %24 = sbr.rel (!%p22_p3) target bundleno = 12 (0xc), region = 103 }
 0x1b8   : > { %s1829_s20 = smov %s1825_s10 }
 0x1b9   : > { %s1831_s22 = smov %s1826_s30 }
 0x1bc   :  { %765 = vsyncpa [#allocation3], 1 }
 0x1bd   :  { %767 = vsyncpa [#allocation3 + $0x1], 1 }
 0x1be   :  { %768 = vsyncpa [#allocation8], 1 }
 0x1bf   :  { %770 = vsyncpa [#allocation8 + $0x1], 1 }
 0x1c0   :  { %771 = vsyncpa [#allocation4], 1 }
 0x1c1   :  { %773 = vsyncpa [#allocation4 + $0x1], 1 }
 0x1c2   :  { %774 = vsyncpa [#allocation5], 1 }
 0x1c3   :  { %776 = vsyncpa [#allocation5 + $0x1], 1 }

</bundles_post_ra>
